<compile_context>
chip_gen: v7x
topology: tpu7x:2x2x1
jax: 0.10.0
libtpu: 0.0.40
codegen_flags: <defaults>
</compile_context>

<pallas_src>
import jax
import jax.numpy as jnp
from jax.experimental import pallas as pl
from jax.experimental.pallas import tpu as pltpu

EPS = 1e-6


def skip_connection_kernel(x_ref, w_ref, b_ref, alpha_ref, bias_ref,
                           o_ref, normed_ref):
    # x_ref:      (TM, H)  full-width row tile (LN input AND residual source)
    # w_ref:      (H, TN)  Linear weight column slab, bf16
    # b_ref:      (1, TN)  Linear bias slab, f32
    # alpha/bias: (1, 1)   LayerNorm scalars in SMEM
    # o_ref:      (TM, TN) output block
    # normed_ref: (TM, H)  bf16 VMEM scratch: LN output, reused across j
    j = pl.program_id(1)
    tn = o_ref.shape[-1]
    h = x_ref.shape[-1]

    # --- LayerNorm hoisted: done once per row tile (j == 0), carried across
    #     the (sequential, "arbitrary") column axis via the bf16 scratch. ---
    @pl.when(j == 0)
    def _():
        x = x_ref[...].astype(jnp.float32)
        mean = jnp.mean(x, axis=-1, keepdims=True)
        centered = x - mean
        # PyTorch semantics: unbiased std (N-1), denominator (std + eps).
        var_unbiased = jnp.sum(centered * centered, axis=-1,
                               keepdims=True) * (1.0 / (h - 1))
        std = jnp.sqrt(var_unbiased)
        scale = alpha_ref[0, 0] / (std + EPS)   # exact; off the hot path now
        normed = scale * centered + bias_ref[0, 0]
        normed_ref[...] = normed.astype(jnp.bfloat16)

    # --- sublayer: Linear(H -> TN columns) on the MXU, bf16 in / f32 acc ---
    y = jnp.dot(normed_ref[...], w_ref[...],
                preferred_element_type=jnp.float32)
    y = y + b_ref[...]

    # --- dropout (eval mode) identity; residual sliced from the resident x
    #     tile (no second HBM read of x). ---
    if tn == h:
        xres = x_ref[...].astype(jnp.float32)
    else:
        col0 = pl.multiple_of(j * tn, 128)      # tn is a multiple of 128 here
        xres = x_ref[:, pl.ds(col0, tn)].astype(jnp.float32)
    o_ref[...] = (xres + y).astype(o_ref.dtype)


def _round_up(n, m):
    return ((n + m - 1) // m) * m


def _vmem_limit_bytes():
    """Generation-aware scoped-VMEM limit (leaves compiler headroom)."""
    try:
        cap = pltpu.get_tpu_info().vmem_capacity_bytes
    except Exception:
        cap = 64 * 1024 * 1024     # conservative fallback (v7x per-TC physical)
    # ~102 MiB on v5e/v6e (128 MiB physical), ~51 MiB on v7x (64 MiB physical).
    return max(32 * 1024 * 1024, int(cap * 0.8))


def _vmem_bytes(tm, tn, H):
    # Double-buffered pipeline estimate:
    #   x tile   2*tm*H*4 (f32 worst case) + W slab 2*H*tn*2 (bf16)
    #   + bias 2*tn*4 + out 2*tm*tn*4 + LN scratch tm*H*2 (single buffer)
    return (2 * tm * H * 4 + 2 * H * tn * 2 + 2 * tn * 4
            + 2 * tm * tn * 4 + tm * H * 2)


def _pick_tiles(rows, H, budget):
    # --- output-column tile ---
    if H % 128 == 0:
        # Drop column tiling entirely (W resident, DMA'd once) when the
        # double-buffered bf16 weight fits in ~1/3 of the budget.
        if 4 * H * H <= budget // 3:
            tn = H
        else:
            tn = 512 if H % 512 == 0 else 128
            while H % tn:
                tn -= 128
            tn = max(tn, 128)
    else:
        tn = H   # full-extent last dim satisfies the (8,128) rule

    # --- row tile: largest multiple of 8 within the VMEM budget, cap 1024 ---
    tm_cap = min(1024, _round_up(rows, 8))
    tm = 8
    t = 8
    while t <= tm_cap:
        if _vmem_bytes(t, tn, H) <= budget:
            tm = t
        t += 8

    # Prefer a tm that divides rows exactly (skip wrapper pad + tail slice),
    # unless that would shrink the tile too much.
    if rows % 8 == 0 and rows % tm != 0:
        best = None
        for cand in range(min(tm, rows), 7, -8):
            if rows % cand == 0:
                best = cand
                break
        if best is not None and best >= max(8, tm // 4):
            tm = best
    return tm, tn


def skip_connection(x, w, b, alpha, bias):
    """x: (B, S, H). w: (H, H). b: (H,). alpha/bias: (1,). Returns (B, S, H)."""
    B, S, H = x.shape
    assert H >= 2, "LayerNorm with unbiased std needs H >= 2"
    rows = B * S

    vmem_limit = _vmem_limit_bytes()
    budget = vmem_limit - 4 * 1024 * 1024
    tm, tn = _pick_tiles(rows, H, budget)

    # Prefer >= 2 row tiles so v7x's two TensorCores both get work.
    if rows >= 16 and rows % 16 == 0 and tm >= rows:
        tm = rows // 2

    padded_rows = _round_up(rows, tm)

    x2 = x.reshape(rows, H)             # keep native dtype; kernel casts to f32
    if padded_rows != rows:
        # Zero rows are safe through LN (centered == 0) and are sliced off below.
        x2 = jnp.pad(x2, ((0, padded_rows - rows), (0, 0)))

    w_bf16 = w.astype(jnp.bfloat16)     # halves W DMA bytes, MXU-native
    b2 = b.reshape(1, H).astype(jnp.float32)
    alpha2 = jnp.asarray(alpha, jnp.float32).reshape(1, 1)
    bias2 = jnp.asarray(bias, jnp.float32).reshape(1, 1)

    grid = (padded_rows // tm, H // tn)

    out = pl.pallas_call(
        skip_connection_kernel,
        out_shape=jax.ShapeDtypeStruct((padded_rows, H), x.dtype),
        grid_spec=pltpu.PrefetchScalarGridSpec(
            num_scalar_prefetch=0,
            grid=grid,
            in_specs=[
                # Full-width x row tile (LN input + residual); constant in j so
                # it is fetched once per row tile.
                pl.BlockSpec((tm, H), lambda i, j: (i, 0)),
                # Weight column slab (bf16); constant in i so it is not
                # re-fetched across row tiles when tn == H.
                pl.BlockSpec((H, tn), lambda i, j: (0, j)),
                # Bias column slab.
                pl.BlockSpec((1, tn), lambda i, j: (0, j)),
                # LayerNorm scalars in SMEM.
                pl.BlockSpec(memory_space=pltpu.MemorySpace.SMEM),
                pl.BlockSpec(memory_space=pltpu.MemorySpace.SMEM),
            ],
            out_specs=pl.BlockSpec((tm, tn), lambda i, j: (i, j)),
            scratch_shapes=[pltpu.VMEM((tm, H), jnp.bfloat16)],
        ),
        compiler_params=pltpu.CompilerParams(
            # j carries the LN scratch across column tiles -> must be
            # sequential ("arbitrary"); the row axis shards across cores.
            dimension_semantics=("parallel", "arbitrary"),
            vmem_limit_bytes=vmem_limit,
        ),
    )(x2, w_bf16, b2, alpha2, bias2)

    if padded_rows != rows:
        out = out[:rows]
    return out.reshape(B, S, H)


def _reference(x, w, b, alpha, bias):
    xf = x.astype(jnp.float32)
    mean = jnp.mean(xf, axis=-1, keepdims=True)
    centered = xf - mean
    std = jnp.sqrt(jnp.sum(centered * centered, axis=-1, keepdims=True) /
                   (xf.shape[-1] - 1))
    normed = alpha * centered / (std + EPS) + bias
    # Match the kernel's bf16 MXU path (f32 accumulation).
    y = jnp.einsum("bsh,hk->bsk", normed.astype(jnp.bfloat16),
                   w.astype(jnp.bfloat16),
                   preferred_element_type=jnp.float32) + b
    return xf + y


if __name__ == "__main__":
    B, S, H = 2, 8, 32
    key = jax.random.PRNGKey(0)
    kx, kw, kb = jax.random.split(key, 3)

    x = jax.random.normal(kx, (B, S, H), dtype=jnp.float32)
    # Deterministic sublayer (Linear) parameters.
    w = jax.random.normal(kw, (H, H), dtype=jnp.float32) * (1.0 / jnp.sqrt(H))
    b = jax.random.normal(kb, (H,), dtype=jnp.float32) * 0.01
    # LayerNormalization params as initialized in the module.
    alpha = jnp.ones((1,), dtype=jnp.float32)
    bias = jnp.zeros((1,), dtype=jnp.float32)

    out = skip_connection(x, w, b, alpha, bias)
    out = jax.block_until_ready(out)

    ref = _reference(x, w, b, alpha, bias)
    assert out.shape == (B, S, H)
    # bf16 matmul -> relaxed tolerance vs the f32 LayerNorm reference.
    assert jnp.allclose(out, ref, atol=2e-2, rtol=2e-2), (
        float(jnp.max(jnp.abs(out - ref))))

    print("KERNEL_OK")
</pallas_src>

<mosaic_0001>
module attributes {stable_mosaic.version = 11 : i64} {
  func.func @skip_connection_kernel(%arg0: i32, %arg1: i32, %arg2: memref<8x32xf32, #tpu.memory_space<vmem>>, %arg3: memref<32x32xbf16, #tpu.memory_space<vmem>>, %arg4: memref<1x32xf32, #tpu.memory_space<vmem>>, %arg5: memref<1x1xf32, #tpu.memory_space<smem>>, %arg6: memref<1x1xf32, #tpu.memory_space<smem>>, %arg7: memref<8x32xf32, #tpu.memory_space<vmem>>, %arg8: memref<8x32xbf16, #tpu.memory_space<vmem>>) attributes {dimension_semantics = [#tpu.dimension_semantics<parallel>, #tpu.dimension_semantics<arbitrary>], iteration_bounds = array<i64: 2, 1>, scalar_prefetch = 0 : i64, scratch_operands = 1 : i64, tpu.core_type = #tpu.core_type<tc>, window_params = [{transform_indices = @transform_0, window_bounds = array<i64: 8, 32>}, {transform_indices = @transform_1, window_bounds = array<i64: 32, 32>}, {transform_indices = @transform_2, window_bounds = array<i64: 1, 32>}, {transform_indices = @transform_3, window_bounds = array<i64: 1, 1>}, {transform_indices = @transform_4, window_bounds = array<i64: 1, 1>}, {transform_indices = @transform_5, window_bounds = array<i64: 8, 32>}]} {
    %c0_i32 = arith.constant 0 : i32
    %0 = arith.cmpi eq, %arg1, %c0_i32 : i32
    %1 = arith.extui %0 : i1 to i32
    %c0_i32_0 = arith.constant 0 : i32
    %2 = arith.cmpi ne, %1, %c0_i32_0 : i32
    scf.if %2 {
      %c0_10 = arith.constant 0 : index
      %c0_11 = arith.constant 0 : index
      %12 = vector.load %arg2[%c0_10, %c0_11] : memref<8x32xf32, #tpu.memory_space<vmem>>, vector<8x32xf32>
      %cst_12 = arith.constant dense<0.000000e+00> : vector<8xf32>
      %13 = vector.multi_reduction <add>, %12, %cst_12 [1] : vector<8x32xf32> to vector<8xf32>
      %14 = vector.shape_cast %13 : vector<8xf32> to vector<8x1xf32>
      %cst_13 = arith.constant 3.200000e+01 : f32
      %15 = vector.broadcast %cst_13 : f32 to vector<8x1xf32>
      %16 = arith.divf %14, %15 : vector<8x1xf32>
      %17 = vector.broadcast %16 : vector<8x1xf32> to vector<8x32xf32>
      %18 = arith.subf %12, %17 : vector<8x32xf32>
      %19 = arith.mulf %18, %18 : vector<8x32xf32>
      %cst_14 = arith.constant dense<0.000000e+00> : vector<8xf32>
      %20 = vector.multi_reduction <add>, %19, %cst_14 [1] : vector<8x32xf32> to vector<8xf32>
      %21 = vector.shape_cast %20 : vector<8xf32> to vector<8x1xf32>
      %cst_15 = arith.constant 0.0322580636 : f32
      %22 = vector.broadcast %cst_15 : f32 to vector<8x1xf32>
      %23 = arith.mulf %21, %22 : vector<8x1xf32>
      %24 = math.sqrt %23 : vector<8x1xf32>
      %c0_16 = arith.constant 0 : index
      %c0_17 = arith.constant 0 : index
      %25 = memref.load %arg5[%c0_16, %c0_17] : memref<1x1xf32, #tpu.memory_space<smem>>
      %cst_18 = arith.constant 9.99999997E-7 : f32
      %26 = vector.broadcast %cst_18 : f32 to vector<8x1xf32>
      %27 = arith.addf %24, %26 : vector<8x1xf32>
      %28 = vector.broadcast %25 : f32 to vector<8x1xf32>
      %29 = arith.divf %28, %27 : vector<8x1xf32>
      %30 = vector.broadcast %29 : vector<8x1xf32> to vector<8x32xf32>
      %31 = arith.mulf %30, %18 : vector<8x32xf32>
      %c0_19 = arith.constant 0 : index
      %c0_20 = arith.constant 0 : index
      %32 = memref.load %arg6[%c0_19, %c0_20] : memref<1x1xf32, #tpu.memory_space<smem>>
      %33 = vector.broadcast %32 : f32 to vector<8x32xf32>
      %34 = arith.addf %31, %33 : vector<8x32xf32>
      %35 = arith.truncf %34 : vector<8x32xf32> to vector<8x32xbf16>
      %c0_21 = arith.constant 0 : index
      %c0_22 = arith.constant 0 : index
      %36 = vector.load %arg8[%c0_21, %c0_22] : memref<8x32xbf16, #tpu.memory_space<vmem>>, vector<8x32xbf16>
      tpu.vector_store %arg8[%c0_21, %c0_22], %35 {strides = array<i32>} : memref<8x32xbf16, #tpu.memory_space<vmem>>, vector<8x32xbf16>,
    } else {
    }
    %c0 = arith.constant 0 : index
    %c0_1 = arith.constant 0 : index
    %3 = vector.load %arg8[%c0, %c0_1] : memref<8x32xbf16, #tpu.memory_space<vmem>>, vector<8x32xbf16>
    %c0_2 = arith.constant 0 : index
    %c0_3 = arith.constant 0 : index
    %4 = vector.load %arg3[%c0_2, %c0_3] : memref<32x32xbf16, #tpu.memory_space<vmem>>, vector<32x32xbf16>
    %cst = arith.constant dense<0.000000e+00> : vector<8x32xf32>
    %5 = tpu.matmul %3, %4, %cst {dimension_numbers = #tpu.dot_dimension_numbers<[1], [0], [0], [1], [0, 0, 1, 1], [], []>} : vector<8x32xbf16>, vector<32x32xbf16>, vector<8x32xf32> -> vector<8x32xf32>
    %c0_4 = arith.constant 0 : index
    %c0_5 = arith.constant 0 : index
    %6 = vector.load %arg4[%c0_4, %c0_5] : memref<1x32xf32, #tpu.memory_space<vmem>>, vector<1x32xf32>
    %7 = vector.broadcast %6 : vector<1x32xf32> to vector<8x32xf32>
    %8 = arith.addf %5, %7 : vector<8x32xf32>
    %c0_6 = arith.constant 0 : index
    %c0_7 = arith.constant 0 : index
    %9 = vector.load %arg2[%c0_6, %c0_7] : memref<8x32xf32, #tpu.memory_space<vmem>>, vector<8x32xf32>
    %10 = arith.addf %9, %8 : vector<8x32xf32>
    %c0_8 = arith.constant 0 : index
    %c0_9 = arith.constant 0 : index
    %11 = vector.load %arg7[%c0_8, %c0_9] : memref<8x32xf32, #tpu.memory_space<vmem>>, vector<8x32xf32>
    tpu.vector_store %arg7[%c0_8, %c0_9], %10 {strides = array<i32>} : memref<8x32xf32, #tpu.memory_space<vmem>>, vector<8x32xf32>,
    return
  }
  func.func @transform_0(%arg0: i32, %arg1: i32) -> (i32, i32) {
    %c0_i32 = arith.constant 0 : i32
    %c0_i32_0 = arith.constant 0 : i32
    return %arg0, %c0_i32 : i32, i32
  }
  func.func @transform_1(%arg0: i32, %arg1: i32) -> (i32, i32) {
    %c0_i32 = arith.constant 0 : i32
    %c0_i32_0 = arith.constant 0 : i32
    return %c0_i32, %arg1 : i32, i32
  }
  func.func @transform_2(%arg0: i32, %arg1: i32) -> (i32, i32) {
    %c0_i32 = arith.constant 0 : i32
    %c0_i32_0 = arith.constant 0 : i32
    return %c0_i32, %arg1 : i32, i32
  }
  func.func @transform_3(%arg0: i32, %arg1: i32) -> (i32, i32) {
    %c0_i32 = arith.constant 0 : i32
    %c0_i32_0 = arith.constant 0 : i32
    %c0_i32_1 = arith.constant 0 : i32
    return %c0_i32, %c0_i32_0 : i32, i32
  }
  func.func @transform_4(%arg0: i32, %arg1: i32) -> (i32, i32) {
    %c0_i32 = arith.constant 0 : i32
    %c0_i32_0 = arith.constant 0 : i32
    %c0_i32_1 = arith.constant 0 : i32
    return %c0_i32, %c0_i32_0 : i32, i32
  }
  func.func @transform_5(%arg0: i32, %arg1: i32) -> (i32, i32) {
    %c0_i32 = arith.constant 0 : i32
    return %arg0, %arg1 : i32, i32
  }
}

</mosaic_0001>

<bundles_post_ra>
// kernel: tpu_custom_call.1
= control target key start
LH: loop header
LB: loop body
LE: loop exit
PB: predicated region body
PF: predicated region fallthrough
CT: control target
= control target key end

     0   :  { %s1046_s0 = inlined_call_operand.hbm [shape: f32[16,32], index: 0, kind: input, shape index: {}]   ;;  %s1047_s1 = inlined_call_operand.hbm [shape: bf16[32,32], index: 1, kind: input, shape index: {}]   ;;  %s1048_s2 = inlined_call_operand.vmem [shape: f32[1,32], index: 2, kind: input, shape index: {}]   ;;  %s1049_s3 = inlined_call_operand.<no memory space> [shape: f32[1,1], index: 3, kind: input, shape index: {}]   ;;  %s1050_s4 = inlined_call_operand.<no memory space> [shape: f32[1,1], index: 4, kind: input, shape index: {}]   ;;  %s1051_s5 = inlined_call_operand.hbm [shape: f32[16,32], index: 5, kind: output, shape index: {}]  }
   0x1   :  { %10 = sst [smem:[#allocation3]] %s1049_s3 }
   0x2   :  { %11 = sst [smem:[#allocation4]] %s1050_s4 }
   0x3   :  { %12 = vsyncpa [#allocation6], 0 }
   0x4   :  { %14 = vsyncpa [#allocation6 + $0x1], 0 }
   0x5   :  { %15 = vsyncpa [#allocation9], 0 }
   0x6   :  { %16 = vsyncpa [#allocation7], 0 }
   0x7   :  { %18 = vsyncpa [#allocation7 + $0x1], 0  ;;  %s821_s22 = smov 0   ;;  %s823_s23 = smov 0  }
   0x8   :  { %s825_s24 = smov 0   ;;  %s827_s25 = smov 0  }
   0x9   :  { %s829_s26 = smov 0   ;;  %s831_s3 = smov 0  }
   0xa LB: > { %s518_s4 = sadd.s32 4294967295, %s776_s3   ;;  %s519_s27 = sadd.s32 4294967294, %s776_s3   ;;  %s776_s3 = sphi %s831_s3, %s24_s3   ;;  %s772_s26 = sphi %s829_s26, %s1075_s26   ;;  %s768_s25 = sphi %s827_s25, %s1074_s25   ;;  %s764_s24 = sphi %s825_s24, %s1073_s24   ;;  %s760_s23 = sphi %s823_s23, %s1072_s23   ;;  %s756_s22 = sphi %s821_s22, %s1071_s22  }
   0xb   : > { %p56_p0 = scmp.ne.s32.totalorder %s760_s23, %s756_s22  ;;  %p855_p1 = scmp.eq.s32.totalorder %s518_s4, 0 }
   0xc   : > { %p859_p2 = scmp.eq.s32.totalorder %s518_s4, 1  ;;  %p182_p3 = scmp.eq.s32.totalorder %s519_s27, 1 }
   0xd   : > { %s1056_s28 = scalar_select %p855_p1, 1, 0 }
   0xe   : > { %s1057_s29 = scalar_select %p859_p2, 1, 0 }
   0xf   : > { %p865_p4 = por %p855_p1, %p56_p0  ;;  %p520_p5 = scmp.ge.s32.totalorder %s776_s3, 1 }
  0x10   : > { %p870_p6 = por %p182_p3, %p56_p0  ;;  %p189_p7 = scmp.lt.s32.totalorder %s776_s3, 3 }
  0x11   : > { %s1058_s30 = scalar_select %p865_p4, 1, 0 }
  0x12   : > { %s1059_s6 = scalar_select %p870_p6, 1, 0 }
  0x13   : > { %p875_p8 = pnand %p520_p5, %p189_p7  ;;  %s778_s8 = smov [#allocation8]  }
  0x14   : > { %s203_s9 = sshll.u32 %s778_s8, 4  ;;  %s36_s11 = sadd.s32 1, %s772_s26  ;;  %s204_s9 = int_to_ptr.vmem [resolvable:$true] %s203_s9 }
  0x15   : > { %s1060_s7 = scalar_select %p875_p8, 1, 0 }
  0x16   : > { %p557_p9 = pneg %p875_p8  ;;  %s632_s14 = scalar_lea.hbm %s1047_s1, 256 }
  0x17   : > { %p633_p12 = scmp.ne.s32.totalorder %s1047_s1, %s632_s14  ;;  %p639_p5 = scmp.lt.u32.totalorder %s632_s14, %s1047_s1 }
  0x18   : > { %p884_p11 = pnand %p557_p9, %p855_p1 }
  0x1a   : > { %p634_p13 = pneg %p884_p11 }
  0x1c   : > { %p635_p0 = pnand %p634_p13, %p633_p12 }
  0x1e   : > { %p636_p3 = pneg %p635_p0 }
  0x20   : > { %p641_p7 = pnand %p639_p5, %p636_p3 }
  0x22   : > { %644 = shalt.err (!%p641_p7)
}
  0x23   : > { %s645_s19 = scalar_lea.vmem %s204_s9, 256  ;;  %p653_p1 = scmp.lt.s32.totalorder %s204_s9, %s204_s9 }
  0x24   : > { %p646_p9 = scmp.ne.s32.totalorder %s204_s9, %s645_s19  ;;  %p654_p4 = scmp.lt.s32.totalorder %s645_s19, %s645_s19 }
  0x26   : > { %p648_p10 = pnand %p646_p9, %p634_p13  ;;  %p655_p8 = por %p654_p4, %p653_p1 }
  0x28   : > { %p649_p6 = pneg %p648_p10 }
  0x2a   : > { %p656_p2 = pnand %p655_p8, %p649_p6 }
  0x2c   : > { %659 = shalt.err (!%p656_p2)
}
  0x2d   : > { %s779_s20 = smov 64   ;;  %s780_s21 = smov 4  }
  0x2e   : > { %560 = dma.hbm_to_vmem [thread:$0]  (!%p884_p11), %s1047_s1, 256, %s204_s9, [#allocation9], %s779_s20, %s779_s20, %s780_s21  }
  0x2f   : > { %p38_p1 = scmp.ge.s32.totalorder %s36_s11, 2  ;;  %s43_s8 = sadd.s32 1, %s764_s24 }
  0x30   : > { %p50_p2 = scmp.ne.s32.totalorder %s764_s24, %s760_s23  ;;  %p51_p4 = scmp.eq.s32.totalorder %s776_s3, 0 }
  0x31   : > { %s1077_s11 = smov (%p38_p1, %s36_s11), 0  ;;  %p1063_p8 = scmp.ne.s32.totalorder %s1057_s29, 0 }
  0x32   : > { %p911_p6 = por %p51_p4, %p50_p2  ;;  %s40_s10 = ssub.s32 %s772_s26, %s1077_s11 }
  0x33   : > { %p917_p10 = por %p1063_p8, %p50_p2  ;;  %p570_p12 = scmp.lt.s32.totalorder %s776_s3, 2 }
  0x34   : > { %p41_p11 = scmp.eq.s32.totalorder %s40_s10, 0  ;;  %s229_s9 = sand.u32 1, %s764_s24  }
  0x35   : > { %s524_s14 = sshll.u32 %s229_s9, 3  ;;  %s525_s16 = sshll.u32 %s772_s26, 7 }
  0x36   : > { %s926_s15 = scalar_select %p41_p11, %s764_s24, %s43_s8  }
  0x37   : > { %s932_s19 = scalar_lea.hbm %s1046_s0, %s525_s16  ;;  %s233_s29 = scalar_lea.vmem [#allocation5], %s524_s14 }
  0x38   : > { %s240_s20 = sshll.u32 %s233_s29, 4  ;;  %p938_p13 = pnand %p570_p12, %p911_p6  ;;  %s934_s20 = int_to_ptr.vmem [resolvable:$true] %s240_s20 }
  0x39   : > { %s230_s4 = scalar_lea.sflag [#allocation6], %s229_s9  ;;  %s660_s27 = scalar_lea.hbm %s932_s19, 128 }
  0x3a   : > { %p661_p0 = scmp.ne.s32.totalorder %s932_s19, %s660_s27  ;;  %p662_p3 = pneg %p938_p13 }
  0x3b   : > { %s665_s14 = scalar_lea.hbm %s1046_s0, 256  ;;  %p666_p9 = scmp.lt.u32.totalorder %s932_s19, %s1046_s0 }
  0x3c   : > { %p663_p5 = pnand %p662_p3, %p661_p0  ;;  %p667_p1 = scmp.lt.u32.totalorder %s665_s14, %s660_s27 }
  0x3d   : > { %p669_p4 = scmp.lt.u32.totalorder %s660_s27, %s932_s19 }
  0x3e   : > { %p664_p7 = pneg %p663_p5  ;;  %p668_p2 = por %p667_p1, %p666_p9 }
  0x40   : > { %p670_p6 = por %p669_p4, %p668_p2 }
  0x42   : > { %p671_p8 = pnand %p670_p6, %p664_p7 }
  0x44   : > { %674 = shalt.err (!%p671_p8)
}
  0x45   : > { %s675_s9 = scalar_lea.vmem %s934_s20, 128  ;;  %s781_s17 = smov [#allocation5]  }
  0x46   : > { %p676_p12 = scmp.ne.s32.totalorder %s934_s20, %s675_s9  ;;  %s680_s18 = sshll.u32 %s781_s17, 4  ;;  %s681_s18 = int_to_ptr.vmem [resolvable:$false] %s680_s18 }
  0x47   : > { %s682_s29 = scalar_lea.vmem %s681_s18, 256  ;;  %p683_p5 = scmp.lt.s32.totalorder %s934_s20, %s681_s18 }
  0x48   : > { %p678_p11 = pnand %p676_p12, %p662_p3  ;;  %p684_p9 = scmp.lt.s32.totalorder %s682_s29, %s675_s9 }
  0x4a   : > { %p679_p0 = pneg %p678_p11  ;;  %p685_p1 = por %p684_p9, %p683_p5 }
  0x4c   : > { %p686_p2 = pnand %p685_p1, %p679_p0 }
  0x4e   : > { %689 = shalt.err (!%p686_p2)
}
  0x4f   : > { %564 = dma.hbm_to_vmem [thread:$0]  (!%p938_p13), %s932_s19, 128, %s934_s20, %s230_s4  }
  0x50   : > { %p1066_p7 = scmp.ne.s32.totalorder %s1060_s7, 0 }
  0x51   : > { %s970_s27 = sand.u32 (!%p1066_p7), 1, %s760_s23   ;;  %p1067_p3 = scmp.ne.s32.totalorder (!%p1066_p7), %s1058_s30, 0 }
  0x52   : > { %249 = sbr.rel (%p1066_p7) target bundleno = 662 (0x296), region = 40  ;;  %s527_s8 = sshll.u32 (!%p1066_p7), %s970_s27, 3 }
  0x53   : > { %s252_s10 = scalar_lea.sflag (!%p1066_p7), [#allocation6], %s970_s27  ;;  %s255_s14 = scalar_lea.vmem (!%p1066_p7), [#allocation5], %s527_s8 }
  0x59   : > { %743 = dma.done.wait (%p1067_p3), %s252_s10, 128  }
  0x5a   : > { %745 = vsyncadd (%p1067_p3), %s252_s10, 4294967168  ;;  %p1068_p13 = scmp.ne.s32.totalorder %s1056_s28, 0 }
  0x5c   : > { %747 = dma.done.wait (%p1068_p13), [#allocation9], 256  }
  0x5d   : > { %749 = vsyncadd (%p1068_p13), [#allocation9], 4294967040  ;;  %vm298_vm0 = vcmask 261120   ;;  %v297_v0 = vld [vmem:[%s255_s14] sm:$0xff]  ;;  %v626_v7 = vld [vmem:[#allocation8] sm:$0xff]   ;;  %v782_v8 = vmov 0.0  }
  0x5e   : > { %v299_v1 = vsel %vm298_vm0, %v297_v0, 0.0  ;;  %541 = vmatprep.subr.bf16.mxu0 %v782_v8  ;;  %vm783_vm1 = vmmov 0   ;;  %v627_v9 = vld [vmem:[#allocation8 + $0x8] sm:$0xff]   ;;  %s317_s28 = sld [smem:[#allocation3]]  ;;  %vm327_vm4 = vcmask 257024   ;;  %s535_s20 = sshll.u32 %s768_s25, 7 }
  0x5f   : > { %300 = vadd.xlane.f32.xlu0 %v299_v1  ;;  %545 = vmatprep.mubr.msk.bf16.mxu0 %vm783_vm1, %v782_v8  ;;  %s323_s30 = sld [smem:[#allocation4]]  ;;  %v530_v26 = vld [vmem:[%s1048_s2] ss:$0 sm:$0xff]  ;;  %s288_s21 = scalar_lea.vmem [#allocation10], %s527_s8 }
  0x60   : > { %542 = vmatpush3.bf16.msra.mxu0 %v626_v7  ;;  %s415_s4 = sshll.u32 %s288_s21, 4  ;;  %s996_s9 = scalar_lea.hbm %s1051_s5, %s535_s20  ;;  %s998_s4 = int_to_ptr.vmem [resolvable:$true] %s415_s4 }
  0x61   : > { %543 = vmatprep.subr.bf16.mxu0 %v782_v8  ;;  %s401_s25 = scalar_lea.sflag [#allocation7], %s970_s27  ;;  %s690_s17 = scalar_lea.vmem %s998_s4, 128 }
  0x62   : > { %p691_p4 = scmp.ne.s32.totalorder %s998_s4, %s690_s17  ;;  %s784_s18 = smov [#allocation10]  }
  0x63   : > { %s694_s29 = sshll.u32 %s784_s18, 4  ;;  %s695_s29 = int_to_ptr.vmem [resolvable:$false] %s694_s29 }
  0x64   : > { %544 = vmatpush3.bf16.msra.mxu0 %v627_v9  ;;  %v319_v18 = vstv %s317_s28  ;;  %p692_p6 = pnand %p691_p4, %p917_p10  ;;  %s696_s8 = scalar_lea.vmem %s695_s29, 256 }
  0x65   : > { %v324_v21 = vstv %s323_s30  ;;  %p697_p12 = scmp.lt.s32.totalorder %s998_s4, %s695_s29  ;;  %p698_p11 = scmp.lt.s32.totalorder %s696_s8, %s690_s17 }
  0x66   : > { %p693_p8 = pneg %p692_p6 }
  0x67   : > { %p699_p0 = por %p698_p11, %p697_p12 }
  0x69   : > { %p700_p5 = pnand %p699_p0, %p693_p8 }
  0xec   : > { %v301_v2 = vpop.xlane.xlu0 %300 }
  0xed   : > { %v303_v3 = vmul.f32 0.03125, %v301_v2 }
  0xef   : > { %v304_v4 = vsub.f32 %v297_v0, %v303_v3 }
  0xf1   : > { %v305_v5 = vmul.f32 %v304_v4, %v304_v4 }
  0xf3   : > { %v306_v6 = vsel %vm298_vm0, %v305_v5, 0.0 }
  0xf4   : > { %307 = vadd.xlane.f32.xlu0 %v306_v6 }
 0x181   : > { %v308_v10 = vpop.xlane.xlu0 %307 }
 0x182   : > { %v309_v11 = vmul.f32 0.032258064, %v308_v10 }
 0x184   : > { %628 = vrsqrt.f32 %v309_v11  ;;  %vm312_vm2 = vcmp.eq.f32.partialorder %v309_v11, inf  ;;  %v315_v14 = vand.u32 2147483648, %v309_v11  ;;  %vm314_vm3 = vcmp.eq.f32.partialorder %v309_v11, 0.0 }
 0x18e   : > { %v629_v12 = vpop.eup %628 }
 0x18f   : > { %v311_v13 = vmul.f32 %v629_v12, %v309_v11 }
 0x191   : > { %v313_v15 = vsel %vm312_vm2, %v309_v11, %v311_v13 }
 0x192   : > { %v316_v16 = vsel %vm314_vm3, %v315_v14, %v313_v15 }
 0x193   : > { %v318_v17 = vadd.f32 1e-06, %v316_v16 }
 0x195   : > { %630 = vrcp.f32 %v318_v17 }
 0x19f   : > { %v631_v19 = vpop.eup %630 }
 0x1a0   : > { %v321_v20 = vmul.f32 %v631_v19, %v319_v18 }
 0x1a2   : > { %v322_v22 = vmul.f32 %v321_v20, %v304_v4 }
 0x1a4   : > { %v325_v23 = vadd.f32 %v324_v21, %v322_v22 }
 0x1a6   : > { %v326_v24 = vpack.c.bf16 %v325_v23, %v325_v23 }
 0x1a8   : > { %328 = vst.msk [vmem:[#allocation2] sm:$0xf] %vm327_vm4, %v326_v24 }
 0x1af   : > { %v329_v25 = vld [vmem:[#allocation2] sm:$0xf] }
 0x1b0   : > { %546 = vmatmul.mubr.msk.bf16.vlgmr.msra.gmra.mrb[0].mxu0 %vm298_vm0, %v329_v25 }
 0x283   : > { %v391_v27 = vpop.f32.mrb[0].mxu0 }
 0x284   : > { %v392_v28 = vadd.f32 %v530_v26, %v391_v27  ;;  %v547_v29 = vpop.f32.mrb[1].mxu0 }
 0x285   : > { %v394_v30 = vpop.f32.mrb[2].mxu0 }
 0x286   : > { %v398_v31 = vadd.f32 %v392_v28, %v297_v0  ;;  %v548_v32 = vpop.f32.mrb[3].mxu0 }
 0x288   : > { %399 = vst.msk [vmem:[%s288_s21] sm:$0xff] %vm298_vm0, %v398_v31 }
 0x289   : > { %703 = shalt.err (!%p700_p5)
}
 0x28a   : > { %s704_s27 = scalar_lea.hbm %s996_s9, 128  ;;  %s708_s28 = scalar_lea.hbm %s1051_s5, 256 }
 0x28b   : > { %p705_p9 = scmp.ne.s32.totalorder %s996_s9, %s704_s27  ;;  %p709_p7 = scmp.lt.u32.totalorder %s996_s9, %s1051_s5 }
 0x28c   : > { %p710_p3 = scmp.lt.u32.totalorder %s708_s28, %s704_s27  ;;  %p712_p4 = scmp.lt.u32.totalorder %s704_s27, %s996_s9 }
 0x28d   : > { %p706_p1 = pnand %p705_p9, %p917_p10 }
 0x28e   : > { %p711_p13 = por %p710_p3, %p709_p7 }
 0x28f   : > { %p707_p2 = pneg %p706_p1 }
 0x290   : > { %p713_p6 = por %p712_p4, %p711_p13 }
 0x292   : > { %p714_p8 = pnand %p713_p6, %p707_p2 }
 0x294   : > { %717 = shalt.err (!%p714_p8)
}
 0x295   : > { %555 = dma.vmem_to_hbm [thread:$0]  (%p917_p10), %s998_s4, 128, %s996_s9, %s401_s25  }
 0x296 PF: > { %s427_s19 = sand.u32 1, %s756_s22   ;;  %p1069_p12 = scmp.ne.s32.totalorder %s1059_s6, 0 }
 0x297   : > { %p1070_p11 = scmp.ge.s32.totalorder %s776_s3, 2  ;;  %s428_s20 = scalar_lea.sflag [#allocation7], %s427_s19 }
 0x299   : > { %p566_p0 = pnand %p1070_p11, %p1069_p12 }
 0x29b   : > { %751 = dma.done.wait (!%p566_p0), %s428_s20, 128  }
 0x29c   : > { %753 = vsyncadd (!%p566_p0), %s428_s20, 4294967168  ;;  %s24_s3 = sadd.s32 1, %s776_s3   ;;  %s1071_s22 = smov %s760_s23 }
 0x29d   : > { %p21_p5 = scmp.ge.s32.totalorder %s24_s3, 4   ;;  %s1072_s23 = smov %s764_s24 }
 0x29e   : > { %s1073_s24 = smov %s926_s15  ;;  %s1074_s25 = smov %s772_s26 }
 0x29f   : > { %s1075_s26 = smov %s1077_s11  ;;  %23 = sbr.rel (!%p21_p5) target bundleno = 10 (0xa), region = 97 }
 0x2a6   :  { %433 = vsyncpa [#allocation6], 1 }
 0x2a7   :  { %435 = vsyncpa [#allocation6 + $0x1], 1 }
 0x2a8   :  { %436 = vsyncpa [#allocation9], 1 }
 0x2a9   :  { %437 = vsyncpa [#allocation7], 1 }
 0x2aa   :  { %439 = vsyncpa [#allocation7 + $0x1], 1 }

</bundles_post_ra>
